<compile_context>
chip_gen: v7x
topology: tpu7x:2x2x1
jax: 0.10.0
libtpu: 0.0.40
codegen_flags: <defaults>
</compile_context>

<pallas_src>
import functools
import math

import jax
import jax.numpy as jnp
import numpy as np
from jax.experimental import pallas as pl
from jax.experimental.pallas import tpu as pltpu

EPS = 1e-5               # nn.InstanceNorm2d default eps
_VPU_CONV_MAX_C = 8      # at/below this input-channel count the 1x1 conv runs on the VPU
_MAX_GROUPS_FUSED = 32   # unrolled pooling groups allowed in the fused (whole-sample) path
_MAX_GROUPS_TILED = 16   # unrolled pooling groups per spatial tile

_XLU_ROLL_OK = None      # lazily probed: does pltpu.roll match jnp.roll semantics?


def _xlu_roll_ok():
    """One-time probe that pltpu.roll(x, s, axis) == jnp.roll(x, s, axis) here."""
    global _XLU_ROLL_OK
    if _XLU_ROLL_OK is None:
        try:
            def _probe(x_ref, o_ref):
                o_ref[...] = pltpu.roll(x_ref[...], 127, 1)

            x = jnp.broadcast_to(jnp.arange(128, dtype=jnp.float32), (8, 128))
            got = pl.pallas_call(
                _probe, out_shape=jax.ShapeDtypeStruct((8, 128), jnp.float32))(x)
            _XLU_ROLL_OK = bool(jnp.array_equal(got, jnp.roll(x, 127, axis=1)))
        except Exception:
            _XLU_ROLL_OK = False
    return _XLU_ROLL_OK


def _roll_lanes(x, neg_shift, use_xlu):
    """x rolled by -neg_shift along the lane (last) axis."""
    if use_xlu:
        n = x.shape[-1]
        return pltpu.roll(x, n - neg_shift, x.ndim - 1)
    return jnp.roll(x, -neg_shift, axis=-1)


def _norm_conv_pool(xn, w_ref, b_ref, sel_ref, o_ref, *, img_w, group_lanes,
                    use_xlu_roll):
    """Shared tile body.  xn: (C_in, T) float32, already InstanceNorm-normalized.

    w_ref  : (C_out, C_in)    1x1 conv weight
    b_ref  : (C_out, 1)       conv bias
    sel_ref: (L, L//4)        constant 0/1 pooling-selection matrix (L = group_lanes)
    o_ref  : (1, C_out, T//4) pooled output tile
    """
    tile_lanes = xn.shape[-1]
    L = group_lanes
    J = L // 4
    n_groups = tile_lanes // L
    out_bf16 = (o_ref.dtype == jnp.bfloat16)

    # --- ReLU -----------------------------------------------------------------------
    xr = jnp.maximum(xn, 0.0)                                        # (C_in, T) f32

    # --- Conv2d(kernel_size=1): pure channel mixing -----------------------------------
    w = w_ref[...]
    b = b_ref[...].astype(jnp.float32)                               # (C_out, 1)
    c_out, c_in = w.shape
    if c_in <= _VPU_CONV_MAX_C:
        # Tiny contraction: keep it exact on the VPU (statically unrolled MACs).
        wf = w.astype(jnp.float32)
        y = b
        for c in range(c_in):
            y = y + wf[:, c:c + 1] * xr[c:c + 1, :]                  # (C_out, T)
    elif out_bf16:
        # bf16 output: bf16 MXU operands (default-precision f32 matmuls round operands
        # to bf16 anyway), halving operand traffic into the MXU.
        y = jnp.dot(w.astype(jnp.bfloat16), xr.astype(jnp.bfloat16),
                    preferred_element_type=jnp.float32) + b
    else:
        y = jnp.dot(w.astype(jnp.float32), xr,
                    preferred_element_type=jnp.float32) + b

    # --- Dropout(p=0.2): identity under eval() ----------------------------------------
    # TODO(synk): training-mode dropout (random mask + 1/(1-p) scaling) not implemented.

    # --- MaxPool2d(2) in natural row-major lane order ---------------------------------
    # Partners of lane i are i+1 (same image row) and i+W / i+W+1 (next row); after the
    # two shifted maxes, lane 2h'*W + 2w' holds the max of its 2x2 window.  Roll
    # wrap-around only lands on lanes the selection ignores.
    use_xlu = use_xlu_roll and tile_lanes % 128 == 0 and y.shape[0] % 8 == 0
    t1 = jnp.maximum(y, _roll_lanes(y, 1, use_xlu))
    p4 = jnp.maximum(t1, _roll_lanes(t1, img_w, use_xlu))

    # --- Compaction: per row-pair-group (L, L//4) 0/1 selection matmul ----------------
    sel = sel_ref[...]
    if out_bf16:
        sel_b = sel.astype(jnp.bfloat16)
    for g in range(n_groups):
        blk = p4[:, g * L:(g + 1) * L]                               # (C_out, L)
        if out_bf16:
            pooled = jnp.dot(blk.astype(jnp.bfloat16), sel_b,
                             preferred_element_type=jnp.float32)
        else:
            # f32 output: keep the 0/1 gather f32-exact even though the MXU rounds its
            # operands to bf16 (exact hi part + tiny lo residual).
            hi = blk.astype(jnp.bfloat16).astype(jnp.float32)
            lo = blk - hi
            pooled = (jnp.dot(hi, sel, preferred_element_type=jnp.float32)
                      + jnp.dot(lo, sel, preferred_element_type=jnp.float32))
        o_ref[0, :, g * J:(g + 1) * J] = pooled.astype(o_ref.dtype)


def _td_fused_kernel(x_ref, w_ref, b_ref, sel_ref, o_ref, *, img_w, group_lanes,
                     use_xlu_roll):
    """Whole-sample grid step: InstanceNorm stats computed in-kernel (x read from HBM
    exactly once)."""
    x = x_ref[0].astype(jnp.float32)                                 # (C, HW)
    mu = jnp.mean(x, axis=-1, keepdims=True)                         # (C, 1)
    d = x - mu
    var = jnp.mean(d * d, axis=-1, keepdims=True)                    # two-pass (exact)
    inv = jax.lax.rsqrt(var + EPS)
    _norm_conv_pool(d * inv, w_ref, b_ref, sel_ref, o_ref, img_w=img_w,
                    group_lanes=group_lanes, use_xlu_roll=use_xlu_roll)


def _td_tiled_kernel(x_ref, mu_ref, inv_ref, w_ref, b_ref, sel_ref, o_ref, *, img_w,
                     group_lanes, use_xlu_roll):
    """Spatially-tiled grid step: per-(n,c) stats are precomputed and streamed in."""
    x = x_ref[0].astype(jnp.float32)                                 # (C, T)
    xn = (x - mu_ref[0]) * inv_ref[0]
    _norm_conv_pool(xn, w_ref, b_ref, sel_ref, o_ref, img_w=img_w,
                    group_lanes=group_lanes, use_xlu_roll=use_xlu_roll)


def _pool_select_matrix(group_lanes, img_w):
    """0/1 matrix S of shape (L, L//4): for each row-pair p inside the group,
    (p4 @ S)[:, p*(W//2) + w'] = p4[:, p*2W + 2w']."""
    half_w = img_w // 2
    j = np.arange(group_lanes // 4)
    src = (j // half_w) * 2 * img_w + 2 * (j % half_w)
    sel = (np.arange(group_lanes)[:, None] == src[None, :]).astype(np.float32)
    return jnp.asarray(sel)


def _choose_group_lanes(hw, img_w):
    """Lane width of one pooling-selection group: a whole number of image row-pairs,
    128-lane aligned and ~256 lanes when the shape allows it."""
    two_w = 2 * img_w
    aligned = two_w * 128 // math.gcd(two_w, 128)        # lcm(2W, 128)
    if hw % aligned != 0:
        return two_w                                     # unaligned fallback (correct)
    lanes = aligned
    while lanes < 256 and hw % (2 * lanes) == 0:
        lanes *= 2
    return lanes


def _tile_vmem_bytes(c, tile_lanes, group_lanes, itemsize, n_tmp=8):
    """Conservative per-grid-step VMEM estimate: double-buffered I/O tiles, live f32
    in-kernel temporaries, and the constant operands."""
    return (2 * c * tile_lanes * itemsize
            + 2 * c * (tile_lanes // 4) * itemsize
            + n_tmp * c * tile_lanes * 4
            + 2 * group_lanes * (group_lanes // 4) * 4
            + 4 * (c * c + 8 * c))


def _vmem_budget():
    """Generation-aware scoped-VMEM budget (~75% of physical: ~48 MiB on v7x,
    ~96 MiB on v5e/v6e; conservative fallback if the query is unavailable)."""
    try:
        cap = int(pltpu.get_tpu_info().vmem_capacity_bytes)
    except Exception:
        cap = 64 * 1024 * 1024
    return (3 * cap) // 4


def _choose_tile_lanes(hw, group_lanes, c, itemsize, target, budget):
    """Spatial tile (in lanes) for the tiled path: a multiple of the selection group
    dividing H*W, 128-lane aligned for both input and pooled output blocks (or spanning
    the whole sample), under the VMEM budget and the unroll cap."""
    n_groups = hw // group_lanes
    k_start = min(n_groups, max(target // group_lanes, 1), _MAX_GROUPS_TILED)
    for k in range(k_start, 0, -1):
        if n_groups % k:
            continue
        t = group_lanes * k
        if not (t == hw or t % 512 == 0):
            continue
        if _tile_vmem_bytes(c, t, group_lanes, itemsize) <= budget:
            return t
    return hw                                            # single tile spans the sample


def transition_down(x_nchw, w, b, *, tile_hw=2048, fuse_stats=None):
    """Eval-mode Transition_Down.  x: (N,C,H,W); w: (C,C,1,1); b: (C,).
    Returns (N, C, H//2, W//2) in x's dtype."""
    N, C, H, W = x_nchw.shape
    assert H % 2 == 0 and W % 2 == 0, "MaxPool2d(2) needs even H and W"
    HW = H * W
    isz = jnp.dtype(x_nchw.dtype).itemsize

    budget = _vmem_budget()
    L = _choose_group_lanes(HW, W)
    sel = _pool_select_matrix(L, W)                      # (L, L//4) constant
    use_xlu_roll = _xlu_roll_ok()

    # Only free reshapes of the contiguous NCHW tensor - no wrapper transposes.
    x3 = x_nchw.reshape(N, C, HW)
    w2 = w.reshape(C, C)                                 # (C_out, C_in)
    b2 = b.reshape(C, 1)

    # Fused (single HBM read) path: whole sample + temporaries fit in VMEM.
    fused_ok = (_tile_vmem_bytes(C, HW, L, isz) <= budget
                and HW // L <= _MAX_GROUPS_FUSED)
    fuse_stats = fused_ok if fuse_stats is None else (fuse_stats and fused_ok)

    if fuse_stats:
        out3 = pl.pallas_call(
            functools.partial(_td_fused_kernel, img_w=W, group_lanes=L,
                              use_xlu_roll=use_xlu_roll),
            out_shape=jax.ShapeDtypeStruct((N, C, HW // 4), x_nchw.dtype),
            grid=(N,),
            in_specs=[
                pl.BlockSpec((1, C, HW), lambda n: (n, 0, 0)),
                pl.BlockSpec((C, C), lambda n: (0, 0)),
                pl.BlockSpec((C, 1), lambda n: (0, 0)),
                pl.BlockSpec((L, L // 4), lambda n: (0, 0)),
            ],
            out_specs=pl.BlockSpec((1, C, HW // 4), lambda n: (n, 0, 0)),
            compiler_params=pltpu.CompilerParams(
                dimension_semantics=("parallel",),
                vmem_limit_bytes=budget),
        )(x3, w2, b2, sel)
        return out3.reshape(N, C, H // 2, W // 2)

    # Tiled path: per-(n,c) InstanceNorm stats from one fused XLA reduction, then the
    # kernel tiles the spatial axis.  (Single-pass E[x^2]-mu^2 keeps HBM traffic at 2x
    # the input; slight precision trade-off vs two-pass is acceptable for activations.)
    xf = x3.astype(jnp.float32)
    mu = jnp.mean(xf, axis=2, keepdims=True)                                  # (N,C,1)
    var = jnp.maximum(jnp.mean(xf * xf, axis=2, keepdims=True) - mu * mu, 0.0)
    inv = jax.lax.rsqrt(var + EPS)

    T = _choose_tile_lanes(HW, L, C, isz, max(tile_hw, L), budget)
    assert HW % T == 0
    n_tiles = HW // T

    out3 = pl.pallas_call(
        functools.partial(_td_tiled_kernel, img_w=W, group_lanes=L,
                          use_xlu_roll=use_xlu_roll),
        out_shape=jax.ShapeDtypeStruct((N, C, HW // 4), x_nchw.dtype),
        grid=(N, n_tiles),
        in_specs=[
            pl.BlockSpec((1, C, T), lambda n, t: (n, 0, t)),
            # Constant / batch-only block indices: only re-DMA'd when the index changes.
            pl.BlockSpec((1, C, 1), lambda n, t: (n, 0, 0)),
            pl.BlockSpec((1, C, 1), lambda n, t: (n, 0, 0)),
            pl.BlockSpec((C, C), lambda n, t: (0, 0)),
            pl.BlockSpec((C, 1), lambda n, t: (0, 0)),
            pl.BlockSpec((L, L // 4), lambda n, t: (0, 0)),
        ],
        out_specs=pl.BlockSpec((1, C, T // 4), lambda n, t: (n, 0, t)),
        compiler_params=pltpu.CompilerParams(
            dimension_semantics=("parallel", "parallel"),
            vmem_limit_bytes=budget),
    )(x3, mu, inv, w2, b2, sel)

    return out3.reshape(N, C, H // 2, W // 2)


def _reference(x_nchw, w, b):
    """Pure-XLA reference of the same eval-mode forward pass (f32, exact matmul)."""
    x = x_nchw.astype(jnp.float32)
    mean = jnp.mean(x, axis=(2, 3), keepdims=True)
    var = jnp.mean((x - mean) ** 2, axis=(2, 3), keepdims=True)
    xn = (x - mean) / jnp.sqrt(var + EPS)
    xr = jnp.maximum(xn, 0.0)
    co, ci = w.shape[0], w.shape[1]
    y = jnp.einsum('nchw,oc->nohw', xr, w.reshape(co, ci).astype(jnp.float32),
                   precision=jax.lax.Precision.HIGHEST)
    y = y + b.astype(jnp.float32)[None, :, None, None]
    n, c, h, ww = y.shape
    y = y.reshape(n, c, h // 2, 2, ww // 2, 2)
    return jnp.max(jnp.max(y, axis=5), axis=3)


if __name__ == "__main__":
    # --- check 1: tiny f32 shape (fused stats, VPU conv, f32-exact selection) --------
    k1, k2, k3 = jax.random.split(jax.random.PRNGKey(0), 3)
    N, C, H, W = 2, 4, 16, 16
    x_a = jax.random.normal(k1, (N, C, H, W), dtype=jnp.float32)
    w_a = jax.random.normal(k2, (C, C, 1, 1), dtype=jnp.float32) * 0.1
    b_a = jax.random.normal(k3, (C,), dtype=jnp.float32) * 0.1

    out = jax.block_until_ready(transition_down(x_a, w_a, b_a))
    ref = jax.block_until_ready(_reference(x_a, w_a, b_a))
    assert out.shape == (N, C, H // 2, W // 2)
    assert jnp.allclose(out, ref, atol=1e-4, rtol=1e-4), \
        ("check 1 mismatch", float(jnp.max(jnp.abs(out - ref))))

    # --- check 2: bf16 storage, C=64 (MXU bf16 conv), forced spatially-tiled path ----
    k4, k5, k6 = jax.random.split(jax.random.PRNGKey(1), 3)
    N2, C2, H2, W2 = 2, 64, 32, 32
    x_b = jax.random.normal(k4, (N2, C2, H2, W2), dtype=jnp.float32).astype(jnp.bfloat16)
    w_b = (jax.random.normal(k5, (C2, C2, 1, 1), dtype=jnp.float32) * 0.1
           ).astype(jnp.bfloat16)
    b_b = (jax.random.normal(k6, (C2,), dtype=jnp.float32) * 0.1).astype(jnp.bfloat16)

    out2 = jax.block_until_ready(
        transition_down(x_b, w_b, b_b, tile_hw=512, fuse_stats=False))
    ref2 = jax.block_until_ready(
        _reference(x_b.astype(jnp.float32), w_b.astype(jnp.float32),
                   b_b.astype(jnp.float32)))
    assert out2.shape == (N2, C2, H2 // 2, W2 // 2)
    assert out2.dtype == jnp.bfloat16
    assert jnp.allclose(out2.astype(jnp.float32), ref2, atol=2e-2, rtol=2e-2), \
        ("check 2 mismatch", float(jnp.max(jnp.abs(out2.astype(jnp.float32) - ref2))))

    # --- check 3: f32, C=64 (fused in-kernel stats + MXU conv + XLU rolls) -----------
    k7, k8, k9 = jax.random.split(jax.random.PRNGKey(2), 3)
    N3, C3, H3, W3 = 1, 64, 32, 32
    x_c = jax.random.normal(k7, (N3, C3, H3, W3), dtype=jnp.float32)
    w_c = jax.random.normal(k8, (C3, C3, 1, 1), dtype=jnp.float32) * 0.1
    b_c = jax.random.normal(k9, (C3,), dtype=jnp.float32) * 0.1

    out3 = jax.block_until_ready(transition_down(x_c, w_c, b_c))
    ref3 = jax.block_until_ready(_reference(x_c, w_c, b_c))
    assert out3.shape == (N3, C3, H3 // 2, W3 // 2)
    assert jnp.allclose(out3, ref3, atol=2e-2, rtol=2e-2), \
        ("check 3 mismatch", float(jnp.max(jnp.abs(out3 - ref3))))

    print("KERNEL_OK")
</pallas_src>

<mosaic_0001>
module attributes {stable_mosaic.version = 11 : i64} {
  func.func @_probe(%arg0: memref<8x128xf32, #tpu.memory_space<vmem>>, %arg1: memref<8x128xf32, #tpu.memory_space<vmem>>) attributes {dimension_semantics = [], scalar_prefetch = 0 : i64, scratch_operands = 0 : i64, tpu.core_type = #tpu.core_type<tc>} {
    %c0 = arith.constant 0 : index
    %c0_0 = arith.constant 0 : index
    %0 = vector.load %arg0[%c0, %c0_0] : memref<8x128xf32, #tpu.memory_space<vmem>>, vector<8x128xf32>
    %c127_i32 = arith.constant 127 : i32
    %1 = tpu.dynamic_rotate %0 by %c127_i32 dim 1 : vector<8x128xf32>, i32 -> vector<8x128xf32>
    %c0_1 = arith.constant 0 : index
    %c0_2 = arith.constant 0 : index
    %2 = vector.load %arg1[%c0_1, %c0_2] : memref<8x128xf32, #tpu.memory_space<vmem>>, vector<8x128xf32>
    tpu.vector_store %arg1[%c0_1, %c0_2], %1 {strides = array<i32>} : memref<8x128xf32, #tpu.memory_space<vmem>>, vector<8x128xf32>,
    return
  }
}

module attributes {stable_mosaic.version = 11 : i64} {
  func.func @_td_fused_kernel(%arg0: i32, %arg1: memref<1x4x256xf32, #tpu.memory_space<vmem>>, %arg2: memref<4x4xf32, #tpu.memory_space<vmem>>, %arg3: memref<4x1xf32, #tpu.memory_space<vmem>>, %arg4: memref<256x64xf32, #tpu.memory_space<vmem>>, %arg5: memref<1x4x64xf32, #tpu.memory_space<vmem>>) attributes {dimension_semantics = [#tpu.dimension_semantics<parallel>], iteration_bounds = array<i64: 2>, scalar_prefetch = 0 : i64, scratch_operands = 0 : i64, tpu.core_type = #tpu.core_type<tc>, window_params = [{transform_indices = @transform_0, window_bounds = array<i64: 1, 4, 256>}, {pipeline_mode = #tpu.pipeline_mode<synchronous>, transform_indices = @transform_1, window_bounds = array<i64: 4, 4>}, {pipeline_mode = #tpu.pipeline_mode<synchronous>, transform_indices = @transform_2, window_bounds = array<i64: 4, 1>}, {pipeline_mode = #tpu.pipeline_mode<synchronous>, transform_indices = @transform_3, window_bounds = array<i64: 256, 64>}, {transform_indices = @transform_4, window_bounds = array<i64: 1, 4, 64>}]} {
    %c0 = arith.constant 0 : index
    %c0_0 = arith.constant 0 : index
    %c0_1 = arith.constant 0 : index
    %0 = vector.load %arg1[%c0, %c0_0, %c0_1] : memref<1x4x256xf32, #tpu.memory_space<vmem>>, vector<1x4x256xf32>
    %1 = vector.shape_cast %0 : vector<1x4x256xf32> to vector<4x256xf32>
    %cst = arith.constant dense<0.000000e+00> : vector<4xf32>
    %2 = vector.multi_reduction <add>, %1, %cst [1] : vector<4x256xf32> to vector<4xf32>
    %3 = vector.shape_cast %2 : vector<4xf32> to vector<4x1xf32>
    %cst_2 = arith.constant 2.560000e+02 : f32
    %4 = vector.broadcast %cst_2 : f32 to vector<4x1xf32>
    %5 = arith.divf %3, %4 : vector<4x1xf32>
    %6 = vector.broadcast %5 : vector<4x1xf32> to vector<4x256xf32>
    %7 = arith.subf %1, %6 : vector<4x256xf32>
    %8 = arith.mulf %7, %7 : vector<4x256xf32>
    %cst_3 = arith.constant dense<0.000000e+00> : vector<4xf32>
    %9 = vector.multi_reduction <add>, %8, %cst_3 [1] : vector<4x256xf32> to vector<4xf32>
    %10 = vector.shape_cast %9 : vector<4xf32> to vector<4x1xf32>
    %cst_4 = arith.constant 2.560000e+02 : f32
    %11 = vector.broadcast %cst_4 : f32 to vector<4x1xf32>
    %12 = arith.divf %10, %11 : vector<4x1xf32>
    %cst_5 = arith.constant 9.99999974E-6 : f32
    %13 = vector.broadcast %cst_5 : f32 to vector<4x1xf32>
    %14 = arith.addf %12, %13 : vector<4x1xf32>
    %15 = math.rsqrt %14 : vector<4x1xf32>
    %16 = vector.broadcast %15 : vector<4x1xf32> to vector<4x256xf32>
    %17 = arith.mulf %7, %16 : vector<4x256xf32>
    %cst_6 = arith.constant 0.000000e+00 : f32
    %18 = vector.broadcast %cst_6 : f32 to vector<4x256xf32>
    %19 = arith.maximumf %17, %18 : vector<4x256xf32>
    %c0_7 = arith.constant 0 : index
    %c0_8 = arith.constant 0 : index
    %20 = vector.load %arg2[%c0_7, %c0_8] : memref<4x4xf32, #tpu.memory_space<vmem>>, vector<4x4xf32>
    %c0_9 = arith.constant 0 : index
    %c0_10 = arith.constant 0 : index
    %21 = vector.load %arg3[%c0_9, %c0_10] : memref<4x1xf32, #tpu.memory_space<vmem>>, vector<4x1xf32>
    %22 = vector.extract_strided_slice %20 {offsets = [0, 0], sizes = [4, 1], strides = [1, 1]} : vector<4x4xf32> to vector<4x1xf32>
    %23 = vector.extract_strided_slice %19 {offsets = [0, 0], sizes = [1, 256], strides = [1, 1]} : vector<4x256xf32> to vector<1x256xf32>
    %24 = vector.broadcast %22 : vector<4x1xf32> to vector<4x256xf32>
    %25 = vector.broadcast %23 : vector<1x256xf32> to vector<4x256xf32>
    %26 = arith.mulf %24, %25 : vector<4x256xf32>
    %27 = vector.broadcast %21 : vector<4x1xf32> to vector<4x256xf32>
    %28 = arith.addf %27, %26 : vector<4x256xf32>
    %29 = vector.extract_strided_slice %20 {offsets = [0, 1], sizes = [4, 1], strides = [1, 1]} : vector<4x4xf32> to vector<4x1xf32>
    %30 = vector.extract_strided_slice %19 {offsets = [1, 0], sizes = [1, 256], strides = [1, 1]} : vector<4x256xf32> to vector<1x256xf32>
    %31 = vector.broadcast %29 : vector<4x1xf32> to vector<4x256xf32>
    %32 = vector.broadcast %30 : vector<1x256xf32> to vector<4x256xf32>
    %33 = arith.mulf %31, %32 : vector<4x256xf32>
    %34 = arith.addf %28, %33 : vector<4x256xf32>
    %35 = vector.extract_strided_slice %20 {offsets = [0, 2], sizes = [4, 1], strides = [1, 1]} : vector<4x4xf32> to vector<4x1xf32>
    %36 = vector.extract_strided_slice %19 {offsets = [2, 0], sizes = [1, 256], strides = [1, 1]} : vector<4x256xf32> to vector<1x256xf32>
    %37 = vector.broadcast %35 : vector<4x1xf32> to vector<4x256xf32>
    %38 = vector.broadcast %36 : vector<1x256xf32> to vector<4x256xf32>
    %39 = arith.mulf %37, %38 : vector<4x256xf32>
    %40 = arith.addf %34, %39 : vector<4x256xf32>
    %41 = vector.extract_strided_slice %20 {offsets = [0, 3], sizes = [4, 1], strides = [1, 1]} : vector<4x4xf32> to vector<4x1xf32>
    %42 = vector.extract_strided_slice %19 {offsets = [3, 0], sizes = [1, 256], strides = [1, 1]} : vector<4x256xf32> to vector<1x256xf32>
    %43 = vector.broadcast %41 : vector<4x1xf32> to vector<4x256xf32>
    %44 = vector.broadcast %42 : vector<1x256xf32> to vector<4x256xf32>
    %45 = arith.mulf %43, %44 : vector<4x256xf32>
    %46 = arith.addf %40, %45 : vector<4x256xf32>
    %47 = vector.extract_strided_slice %46 {offsets = [0, 1], sizes = [4, 255], strides = [1, 1]} : vector<4x256xf32> to vector<4x255xf32>
    %48 = vector.extract_strided_slice %46 {offsets = [0, 0], sizes = [4, 1], strides = [1, 1]} : vector<4x256xf32> to vector<4x1xf32>
    %49 = tpu.concatenate %47, %48 in 1 : vector<4x255xf32>, vector<4x1xf32> -> vector<4x256xf32>
    %50 = arith.maximumf %46, %49 : vector<4x256xf32>
    %51 = vector.extract_strided_slice %50 {offsets = [0, 16], sizes = [4, 240], strides = [1, 1]} : vector<4x256xf32> to vector<4x240xf32>
    %52 = vector.extract_strided_slice %50 {offsets = [0, 0], sizes = [4, 16], strides = [1, 1]} : vector<4x256xf32> to vector<4x16xf32>
    %53 = tpu.concatenate %51, %52 in 1 : vector<4x240xf32>, vector<4x16xf32> -> vector<4x256xf32>
    %54 = arith.maximumf %50, %53 : vector<4x256xf32>
    %c0_11 = arith.constant 0 : index
    %c0_12 = arith.constant 0 : index
    %55 = vector.load %arg4[%c0_11, %c0_12] : memref<256x64xf32, #tpu.memory_space<vmem>>, vector<256x64xf32>
    %56 = arith.truncf %54 : vector<4x256xf32> to vector<4x256xbf16>
    %57 = arith.extf %56 : vector<4x256xbf16> to vector<4x256xf32>
    %58 = arith.subf %54, %57 : vector<4x256xf32>
    %cst_13 = arith.constant dense<0.000000e+00> : vector<4x64xf32>
    %59 = tpu.matmul %57, %55, %cst_13 {dimension_numbers = #tpu.dot_dimension_numbers<[1], [0], [0], [1], [0, 0, 1, 1], [], []>} : vector<4x256xf32>, vector<256x64xf32>, vector<4x64xf32> -> vector<4x64xf32>
    %cst_14 = arith.constant dense<0.000000e+00> : vector<4x64xf32>
    %60 = tpu.matmul %58, %55, %cst_14 {dimension_numbers = #tpu.dot_dimension_numbers<[1], [0], [0], [1], [0, 0, 1, 1], [], []>} : vector<4x256xf32>, vector<256x64xf32>, vector<4x64xf32> -> vector<4x64xf32>
    %61 = arith.addf %59, %60 : vector<4x64xf32>
    %c0_15 = arith.constant 0 : index
    %c0_16 = arith.constant 0 : index
    %c0_17 = arith.constant 0 : index
    %62 = vector.load %arg5[%c0_15, %c0_16, %c0_17] : memref<1x4x64xf32, #tpu.memory_space<vmem>>, vector<1x4x64xf32>
    %63 = vector.shape_cast %62 : vector<1x4x64xf32> to vector<4x64xf32>
    %64 = vector.shape_cast %61 : vector<4x64xf32> to vector<1x4x64xf32>
    tpu.vector_store %arg5[%c0_15, %c0_16, %c0_17], %64 {strides = array<i32>} : memref<1x4x64xf32, #tpu.memory_space<vmem>>, vector<1x4x64xf32>,
    return
  }
  func.func @transform_0(%arg0: i32) -> (i32, i32, i32) {
    %c0_i32 = arith.constant 0 : i32
    %c0_i32_0 = arith.constant 0 : i32
    %c0_i32_1 = arith.constant 0 : i32
    return %arg0, %c0_i32, %c0_i32_0 : i32, i32, i32
  }
  func.func @transform_1(%arg0: i32) -> (i32, i32) {
    %c0_i32 = arith.constant 0 : i32
    %c0_i32_0 = arith.constant 0 : i32
    %c0_i32_1 = arith.constant 0 : i32
    return %c0_i32, %c0_i32_0 : i32, i32
  }
  func.func @transform_2(%arg0: i32) -> (i32, i32) {
    %c0_i32 = arith.constant 0 : i32
    %c0_i32_0 = arith.constant 0 : i32
    %c0_i32_1 = arith.constant 0 : i32
    return %c0_i32, %c0_i32_0 : i32, i32
  }
  func.func @transform_3(%arg0: i32) -> (i32, i32) {
    %c0_i32 = arith.constant 0 : i32
    %c0_i32_0 = arith.constant 0 : i32
    %c0_i32_1 = arith.constant 0 : i32
    return %c0_i32, %c0_i32_0 : i32, i32
  }
  func.func @transform_4(%arg0: i32) -> (i32, i32, i32) {
    %c0_i32 = arith.constant 0 : i32
    %c0_i32_0 = arith.constant 0 : i32
    %c0_i32_1 = arith.constant 0 : i32
    return %arg0, %c0_i32, %c0_i32_0 : i32, i32, i32
  }
}

</mosaic_0001>

<bundles_post_ra>
// kernel: tpu_custom_call.1
= control target key start
LH: loop header
LB: loop body
LE: loop exit
PB: predicated region body
PF: predicated region fallthrough
CT: control target
= control target key end

     0   :  { %6 = vsyncpa [#allocation3], 0  ;;  %s128_s0 = inlined_call_operand.hbm [shape: f32[8,128], index: 0, kind: input, shape index: {}]   ;;  %s129_s1 = inlined_call_operand.hbm [shape: f32[8,128], index: 1, kind: output, shape index: {}]  }
   0x1   :  { %7 = vsyncpa [#allocation4], 0  ;;  %s91_s6 = smov [#allocation2]   ;;  %s43_s10 = scalar_lea.hbm %s128_s0, 128 }
   0x2   :  { %s14_s7 = sshll.u32 %s91_s6, 4  ;;  %p44_p0 = scmp.ne.s32.totalorder %s128_s0, %s43_s10  ;;  %s15_s7 = int_to_ptr.vmem [resolvable:$true] %s14_s7 }
   0x3   :  { %p47_p1 = scmp.lt.u32.totalorder %s43_s10, %s128_s0 }
   0x5   :  { %p49_p2 = pnand %p47_p1, %p44_p0 }
   0x7   :  { %52 = shalt.err (!%p49_p2)
}
   0x8   :  { %s53_s15 = scalar_lea.vmem %s15_s7, 128  ;;  %p58_p4 = scmp.lt.s32.totalorder %s15_s7, %s15_s7 }
   0x9   :  { %p54_p3 = scmp.ne.s32.totalorder %s15_s7, %s53_s15  ;;  %p59_p5 = scmp.lt.s32.totalorder %s53_s15, %s53_s15 }
   0xb   :  { %p60_p6 = por %p59_p5, %p58_p4 }
   0xd   :  { %p61_p7 = pnand %p60_p6, %p54_p3 }
   0xf   :  { %64 = shalt.err (!%p61_p7)
}
  0x10   :  { %17 = dma.hbm_to_vmem [thread:$0]  %s128_s0, 128, %s15_s7, [#allocation3]  }
  0x11   :  { %87 = dma.done.wait [#allocation3], 128  }
  0x12   :  { %88 = vsyncadd [#allocation3], 4294967168  ;;  %v21_v0 = vld [vmem:[#allocation2] sm:$0xff]  ;;  %s92_s18 = smov 127   ;;  %s93_s19 = smov [#allocation5]  }
  0x13   :  { %22 = vrot.lane.b32.xlu0 %v21_v0, %s92_s18  ;;  %s31_s20 = sshll.u32 %s93_s19, 4  ;;  %s32_s20 = int_to_ptr.vmem [resolvable:$true] %s31_s20 }
  0x14   :  { %s65_s21 = scalar_lea.vmem %s32_s20, 128  ;;  %p70_p9 = scmp.lt.s32.totalorder %s32_s20, %s32_s20 }
  0x15   :  { %p66_p8 = scmp.ne.s32.totalorder %s32_s20, %s65_s21  ;;  %p71_p10 = scmp.lt.s32.totalorder %s65_s21, %s65_s21 }
  0x17   :  { %p72_p11 = por %p71_p10, %p70_p9 }
  0x19   :  { %p73_p12 = pnand %p72_p11, %p66_p8 }
  0x85   :  { %v23_v1 = vpop.permute.xlu0 %22 }
  0x86   :  { %24 = vst [vmem:[#allocation5] sm:$0xff] %v23_v1 }
  0x87   :  { %76 = shalt.err (!%p73_p12)
}
  0x88   :  { %s77_s0 = scalar_lea.hbm %s129_s1, 128 }
  0x89   :  { %p78_p13 = scmp.ne.s32.totalorder %s129_s1, %s77_s0  ;;  %p81_p0 = scmp.lt.u32.totalorder %s77_s0, %s129_s1 }
  0x8b   :  { %p83_p1 = pnand %p81_p0, %p78_p13 }
  0x8d   :  { %86 = shalt.err (!%p83_p1)
}
  0x8e   :  { %34 = dma.vmem_to_hbm [thread:$0]  %s32_s20, 128, %s129_s1, [#allocation4]  }
  0x8f   :  { %89 = dma.done.wait [#allocation4], 128  }
  0x90   :  { %90 = vsyncadd [#allocation4], 4294967168 }
  0x91   :  { %38 = vsyncpa [#allocation3], 1 }
  0x92   :  { %39 = vsyncpa [#allocation4], 1 }

// kernel: tpu_custom_call.1
= control target key start
LH: loop header
LB: loop body
LE: loop exit
PB: predicated region body
PF: predicated region fallthrough
CT: control target
= control target key end

     0   :  { %9 = vsyncpa [#allocation3], 0  ;;  %s1146_s0 = inlined_call_operand.vmem [shape: f32[2,4,256], index: 0, kind: input, shape index: {}]   ;;  %s1147_s1 = inlined_call_operand.vmem [shape: f32[4,4], index: 1, kind: input, shape index: {}]   ;;  %s1148_s2 = inlined_call_operand.vmem [shape: f32[4,1], index: 2, kind: input, shape index: {}]   ;;  %s1149_s3 = inlined_call_operand.vmem [shape: f32[256,64], index: 3, kind: input, shape index: {}]   ;;  %s1150_s4 = inlined_call_operand.hbm [shape: f32[2,4,64], index: 4, kind: output, shape index: {}]  }
   0x1   :  { %11 = vsyncpa [#allocation3 + $0x1], 0  ;;  %s932_s15 = smov 0   ;;  %s934_s16 = smov 0  }
   0x2   :  { %s936_s17 = smov 0   ;;  %s938_s18 = smov 0  }
   0x3 LB: > { %s953_s19 = sadd.s32 4294967295, %s897_s18   ;;  %s635_s20 = sadd.s32 4294967294, %s897_s18   ;;  %s897_s18 = sphi %s938_s18, %s1156_s18   ;;  %s893_s17 = sphi %s936_s17, %s1155_s17   ;;  %s889_s16 = sphi %s934_s16, %s1154_s16   ;;  %s885_s15 = sphi %s932_s15, %s1153_s15  }
   0x4   : > { %s957_s21 = sadd.s32 1, %s897_s18   ;;  %s113_s22 = sadd.s32 1, %s893_s17 }
   0x5   : > { %s110_s23 = ssub.s32 %s897_s18, %s957_s21  ;;  %p123_p0 = scmp.ne.s32.totalorder %s893_s17, %s889_s16 }
   0x6   : > { %p111_p1 = scmp.eq.s32.totalorder %s110_s23, 0  ;;  %p124_p2 = scmp.eq.s32.totalorder %s953_s19, 1 }
   0x7   : > { %p129_p3 = scmp.ne.s32.totalorder %s889_s16, %s885_s15  ;;  %p130_p4 = scmp.eq.s32.totalorder %s635_s20, 1 }
   0x8   : > { %s968_s24 = scalar_select %p111_p1, %s893_s17, %s113_s22  }
   0x9   : > { %p970_p5 = por %p124_p2, %p123_p0  ;;  %p974_p6 = por %p130_p4, %p129_p3 }
   0xa   : > { %p638_p7 = scmp.ge.s32.totalorder %s897_s18, 1  ;;  %p165_p8 = scmp.lt.s32.totalorder %s897_s18, 3 }
   0xc   : > { %p166_p9 = pnand %p638_p7, %p165_p8 }
   0xd   : > { %p191_p10 = scmp.lt.s32.totalorder (!%p166_p9), %s953_s19, 1  ;;  %vm200_vm0 = vcmask (!%p166_p9), 1043456   ;;  %v241_v5 = vld [vmem:[%s1147_s1] sm:$0xf] (!%p166_p9)  ;;  %v899_v6 = vmov (!%p166_p9), 0   ;;  %v900_v7 = vmov (!%p166_p9), 1   ;;  %v212_v13 = vlaneseq (!%p166_p9) }
   0xe   : > { %169 = sbr.rel (%p166_p9) target bundleno = 845 (0x34d), region = 36  ;;  %827 = vset.pattern.permute.xlu1 (!%p166_p9), %v899_v6  ;;  %828 = vset.pattern.permute.xlu0 (!%p166_p9), %v900_v7  ;;  %v242_v8 = vld [vmem:[%s1148_s2] sm:$0xf] (!%p166_p9)  ;;  %v901_v9 = vmov (!%p166_p9), 2   ;;  %v902_v10 = vmov (!%p166_p9), 3   ;;  %vm360_vm1 = vcmask (!%p166_p9), 1039360  }
   0xf   : > { %245 = vperm.xlu1 (!%p166_p9), %827, %v241_v5   ;;  %v903_v11 = vmov (!%p166_p9), 839922192   ;;  %v213_v15 = vshrl.u32 (!%p166_p9), %v212_v13, 7  ;;  %v399_v13 = vld [vmem:[%s1149_s3 + $0x88] sm:$0xff] (!%p166_p9)  ;;  %s905_s8 = smov (!%p166_p9), 112   ;;  %vm374_vm2 = vcmask (!%p166_p9), 916480  }
  0x10   : > { %v210_v12 = vunpack.c.l.s4 (!%p166_p9), %v903_v11  ;;  %s643_s10 = sshll.u32 (!%p166_p9), %s953_s19, 6  ;;  %vm560_vm3 = vcmask (!%p166_p9), 519168  }
  0x11   : > { %v251_v34 = vsub.s32 (!%p166_p9), 0, %v213_v15  ;;  %v255_v35 = vsub.s32 (!%p166_p9), 4, %v213_v15  ;;  %v308_v36 = vsub.s32 (!%p166_p9), 2, %v213_v15  ;;  %v312_v37 = vsub.s32 (!%p166_p9), 6, %v213_v15  ;;  %s1104_s20 = scalar_lea.hbm (!%p166_p9), %s1150_s4, %s643_s10 }
  0x12   : > { %v211_v14 = vunpack.c.0.s8 (!%p166_p9), %v210_v12  ;;  %v334_v38 = vsub.s32 (!%p166_p9), 3, %v213_v15  ;;  %v282_v39 = vsub.s32 (!%p166_p9), 1, %v213_v15  ;;  %v286_v40 = vsub.s32 (!%p166_p9), 5, %v213_v15  ;;  %v398_v12 = vld [vmem:[%s1149_s3 + $0x80] sm:$0xff] (!%p166_p9) }
  0x13   : > { %271 = vperm.xlu1 (!%p166_p9), %827, %v242_v8   ;;  %v338_v45 = vsub.s32 (!%p166_p9), 7, %v213_v15 }
  0x14   : > { %v214_v16 = vsub.s32 (!%p166_p9), %v211_v14, %v213_v15  ;;  %v382_v14 = vld [vmem:[%s1149_s3] sm:$0xff] (!%p166_p9)  ;;  %v717_v15 = vpack.c.bf16 (!%p166_p9), %v399_v13, %v398_v12 }
  0x15   : > { %s192_s27 = scalar_select %p191_p10, %s953_s19, 1 }
  0x16   : > { %750 = vmatprep.subr.bf16.mxu1 %v717_v15  ;;  %718 = vmatprep.subr.bf16.mxu0 %v717_v15  ;;  %s906_s19 = smov [#allocation2]  }
  0x17   : > { %s646_s28 = sshll.u32 %s192_s27, 3  ;;  %829 = vset.pattern.permute.xlu1 %v901_v9  ;;  %s839_s27 = sshll.u32 %s906_s19, 4  ;;  %s840_s27 = int_to_ptr.vmem [resolvable:$false] %s839_s27 }
  0x18   : > { %s195_s5 = scalar_lea.vmem %s1146_s0, %s646_s28  ;;  %303 = vperm.xlu1 %829, %v241_v5   ;;  %s841_s28 = scalar_lea.vmem %s840_s27, 128 }
  0x19   : > { %v196_v0 = vld [vmem:[%s195_s5] sm:$0xff]  ;;  %s904_s5 = smov 127  }
  0x1a   : > { %v198_v1 = vcombine.high %v196_v0, %v196_v0  ;;  %v201_v2 = vsel %vm200_vm0, %v196_v0, 0.0 }
  0x1c   : > { %v202_v3 = vsel %vm200_vm0, %v198_v1, 0.0  ;;  %830 = vset.pattern.permute.xlu1 %v902_v10 }
  0x1d   : > { %v203_v4 = vadd.f32 %v202_v3, %v201_v2  ;;  %329 = vperm.xlu1 %830, %v241_v5  }
  0x1f   : > { %204 = vadd.xlane.f32.xlu0 %v203_v4 }
  0x8e   : > { %v246_v29 = vpop.permute.xlu1 %245 }
  0x92   : > { %v272_v32 = vpop.permute.xlu1 %271 }
  0x97   : > { %v304_v46 = vpop.permute.xlu1 %303 }
  0x9c   : > { %v330_v2 = vpop.permute.xlu1 %329 }
  0xac   : > { %v205_v17 = vpop.xlane.xlu0 %204 }
  0xad   : > { %v207_v18 = vmul.f32 0.00390625, %v205_v17  ;;  %v400_v17 = vld [vmem:[%s1149_s3 + $0x90] sm:$0xff] }
  0xaf   : > { %v215_v19 = vrot.slane %v207_v18, %v214_v16  ;;  %v401_v18 = vld [vmem:[%s1149_s3 + $0x98] sm:$0xff] }
  0xb1   : > { %v217_v20 = vsub.f32 %v196_v0, %v215_v19 }
  0xb3   : > { %v218_v21 = vmul.f32 %v217_v20, %v217_v20 }
  0xb5   : > { %v220_v22 = vcombine.high %v218_v21, %v218_v21  ;;  %v222_v23 = vsel %vm200_vm0, %v218_v21, 0.0  ;;  %v721_v21 = vpack.c.bf16 %v401_v18, %v400_v17 }
  0xb7   : > { %v223_v24 = vsel %vm200_vm0, %v220_v22, 0.0  ;;  %v384_v22 = vld [vmem:[%s1149_s3 + $0x10] sm:$0xff] }
  0xb8   : > { %v224_v25 = vadd.f32 %v223_v24, %v222_v23  ;;  %v385_v23 = vld [vmem:[%s1149_s3 + $0x18] sm:$0xff]  ;;  %v402_v24 = vld [vmem:[%s1149_s3 + $0xa0] sm:$0xff] }
  0xba   : > { %225 = vadd.xlane.f32.xlu0 %v224_v25  ;;  %v403_v25 = vld [vmem:[%s1149_s3 + $0xa8] sm:$0xff] }
  0xd0   : > { %277 = vperm.xlu0 %828, %v241_v5  }
  0xd4   : > { %831 = vset.pattern.permute.xlu0 %v902_v10 }
 0x147   : > { %v226_v26 = vpop.xlane.xlu0 %225 }
 0x148   : > { %v227_v27 = vmul.f32 0.00390625, %v226_v26 }
 0x14a   : > { %v228_v28 = vadd.f32 1e-05, %v227_v27  ;;  %v723_v27 = vpack.c.bf16 %v385_v23, %v384_v22 }
 0x14c   : > { %833 = vrsqrt.f32 %v228_v28  ;;  %v725_v28 = vpack.c.bf16 %v403_v25, %v402_v24 }
 0x14f   : > { %v278_v55 = vpop.permute.xlu0 %277 }
 0x156   : > { %v834_v30 = vpop.eup %833 }
 0x157   : > { %v237_v31 = vrot.slane %v834_v30, %v214_v16  ;;  %v383_v16 = vld [vmem:[%s1149_s3 + $0x8] sm:$0xff] }
 0x158   : > { %v387_v30 = vld [vmem:[%s1149_s3 + $0x28] sm:$0xff] }
 0x159   : > { %v239_v33 = vmul.f32 %v237_v31, %v217_v20  ;;  %v719_v20 = vpack.c.bf16 %v383_v16, %v382_v14  ;;  %v404_v31 = vld [vmem:[%s1149_s3 + $0xb0] sm:$0xff] }
 0x15b   : > { %v240_v41 = vmax.f32 %v239_v33, 0.0  ;;  %752 = vmatpush3.bf16.msra.mxu1 %v719_v20  ;;  %720 = vmatpush3.bf16.msra.mxu0 %v719_v20 }
 0x15c   : > { %754 = vmatprep.subr.bf16.mxu1 %v721_v21  ;;  %722 = vmatprep.subr.bf16.mxu0 %v721_v21 }
 0x15d   : > { %v252_v42 = vrot.slane %v240_v41, %v251_v34  ;;  %v256_v43 = vrot.slane %v240_v41, %v255_v35  ;;  %v309_v44 = vrot.slane %v240_v41, %v308_v36  ;;  %v313_v47 = vrot.slane %v240_v41, %v312_v37  ;;  %v388_v35 = vld [vmem:[%s1149_s3 + $0x30] sm:$0xff]  ;;  %v406_v37 = vld [vmem:[%s1149_s3 + $0xc0] sm:$0xff] }
 0x15e   : > { %v335_v48 = vrot.slane %v240_v41, %v334_v38  ;;  %v283_v49 = vrot.slane %v240_v41, %v282_v39  ;;  %v287_v50 = vrot.slane %v240_v41, %v286_v40  ;;  %v339_v60 = vrot.slane %v240_v41, %v338_v45  ;;  %v390_v41 = vld [vmem:[%s1149_s3 + $0x40] sm:$0xff]  ;;  %v409_v45 = vld [vmem:[%s1149_s3 + $0xd8] sm:$0xff] }
 0x15f   : > { %v262_v51 = vrot.slane %v252_v42, %v251_v34  ;;  %v266_v52 = vrot.slane %v256_v43, %v251_v34  ;;  %v319_v58 = vrot.slane %v309_v44, %v308_v36  ;;  %v323_v59 = vrot.slane %v313_v47, %v308_v36  ;;  %756 = vmatpush3.bf16.msra.mxu1 %v723_v27  ;;  %v389_v36 = vld [vmem:[%s1149_s3 + $0x38] sm:$0xff]  ;;  %v391_v42 = vld [vmem:[%s1149_s3 + $0x48] sm:$0xff]  ;;  %v408_v44 = vld [vmem:[%s1149_s3 + $0xd0] sm:$0xff] }
 0x160   : > { %v293_v53 = vrot.slane %v283_v49, %v282_v39  ;;  %v297_v54 = vrot.slane %v287_v50, %v282_v39  ;;  %v345_v61 = vrot.slane %v335_v48, %v334_v38  ;;  %v349_v7 = vrot.slane %v339_v60, %v334_v38  ;;  %724 = vmatpush3.bf16.msra.mxu0 %v723_v27  ;;  %v407_v38 = vld [vmem:[%s1149_s3 + $0xc8] sm:$0xff]  ;;  %v392_v47 = vld [vmem:[%s1149_s3 + $0x50] sm:$0xff]  ;;  %v393_v48 = vld [vmem:[%s1149_s3 + $0x58] sm:$0xff] }
 0x161   : > { %v267_v56 = vmul.f32 %v262_v51, %v246_v29  ;;  %v268_v57 = vmul.f32 %v266_v52, %v246_v29  ;;  %v324_v3 = vmul.f32 %v319_v58, %v304_v46  ;;  %v325_v6 = vmul.f32 %v323_v59, %v304_v46  ;;  %v386_v29 = vld [vmem:[%s1149_s3 + $0x20] sm:$0xff]  ;;  %758 = vmatprep.subr.bf16.mxu1 %v725_v28  ;;  %v411_v51 = vld [vmem:[%s1149_s3 + $0xe8] sm:$0xff]  ;;  %v413_v58 = vld [vmem:[%s1149_s3 + $0xf8] sm:$0xff] }
 0x162   : > { %v298_v0 = vmul.f32 %v293_v53, %v278_v55  ;;  %v299_v1 = vmul.f32 %v297_v54, %v278_v55  ;;  %v350_v8 = vmul.f32 %v345_v61, %v330_v2  ;;  %v351_v19 = vmul.f32 %v349_v7, %v330_v2  ;;  %726 = vmatprep.subr.bf16.mxu0 %v725_v28  ;;  %v410_v50 = vld [vmem:[%s1149_s3 + $0xe0] sm:$0xff]  ;;  %v395_v54 = vld [vmem:[%s1149_s3 + $0x68] sm:$0xff]  ;;  %v396_v59 = vld [vmem:[%s1149_s3 + $0x70] sm:$0xff] }
 0x163   : > { %v274_v62 = vadd.f32 %v272_v32, %v267_v56  ;;  %v275_v63 = vadd.f32 %v272_v32, %v268_v57  ;;  %v405_v32 = vld [vmem:[%s1149_s3 + $0xb8] sm:$0xff]  ;;  %v727_v33 = vpack.c.bf16 %v387_v30, %v386_v29  ;;  %v731_v39 = vpack.c.bf16 %v389_v36, %v388_v35  ;;  %v394_v53 = vld [vmem:[%s1149_s3 + $0x60] sm:$0xff]  ;;  %v412_v57 = vld [vmem:[%s1149_s3 + $0xf0] sm:$0xff] }
 0x164   : > { %v729_v34 = vpack.c.bf16 %v405_v32, %v404_v31  ;;  %v733_v40 = vpack.c.bf16 %v407_v38, %v406_v37  ;;  %v735_v43 = vpack.c.bf16 %v391_v42, %v390_v41  ;;  %v737_v46 = vpack.c.bf16 %v409_v45, %v408_v44  ;;  %v397_v61 = vld [vmem:[%s1149_s3 + $0x78] sm:$0xff] }
 0x165   : > { %v300_v4 = vadd.f32 %v298_v0, %v274_v62  ;;  %v301_v5 = vadd.f32 %v299_v1, %v275_v63  ;;  %760 = vmatpush3.bf16.msra.mxu1 %v727_v33  ;;  %728 = vmatpush3.bf16.msra.mxu0 %v727_v33  ;;  %v739_v49 = vpack.c.bf16 %v393_v48, %v392_v47 }
 0x166   : > { %762 = vmatprep.subr.bf16.mxu1 %v729_v34  ;;  %730 = vmatprep.subr.bf16.mxu0 %v729_v34  ;;  %v741_v52 = vpack.c.bf16 %v411_v51, %v410_v50  ;;  %v743_v55 = vpack.c.bf16 %v395_v54, %v394_v53  ;;  %v745_v60 = vpack.c.bf16 %v413_v58, %v412_v57 }
 0x167   : > { %v326_v9 = vadd.f32 %v324_v3, %v300_v4  ;;  %v327_v10 = vadd.f32 %v325_v6, %v301_v5  ;;  %v747_v62 = vpack.c.bf16 %v397_v61, %v396_v59 }
 0x169   : > { %v995_v11 = vadd.f32 %v350_v8, %v326_v9  ;;  %v1028_v26 = vadd.f32 %v351_v19, %v327_v10  ;;  %764 = vmatpush3.bf16.msra.mxu1 %v731_v39  ;;  %732 = vmatpush3.bf16.msra.mxu0 %v731_v39 }
 0x16a   : > { %766 = vmatprep.subr.bf16.mxu1 %v733_v40  ;;  %734 = vmatprep.subr.bf16.mxu0 %v733_v40 }
 0x16b   : > { %356 = vrot.lane.b32.xlu1 %v995_v11, %s904_s5 }
 0x16d   : > { %768 = vmatpush3.bf16.msra.mxu1 %v735_v43  ;;  %736 = vmatpush3.bf16.msra.mxu0 %v735_v43 }
 0x16e   : > { %770 = vmatprep.subr.bf16.mxu1 %v737_v46  ;;  %738 = vmatprep.subr.bf16.mxu0 %v737_v46 }
 0x16f   : > { %358 = vrot.lane.b32.xlu1 %v1028_v26, %s904_s5  ;;  %s188_s5 = sand.u32 1, %s889_s16  }
 0x170   : > { %s639_s9 = sshll.u32 %s188_s5, 2  ;;  %s563_s22 = scalar_lea.sflag [#allocation3], %s188_s5 }
 0x171   : > { %772 = vmatpush3.bf16.msra.mxu1 %v739_v49  ;;  %740 = vmatpush3.bf16.msra.mxu0 %v739_v49  ;;  %s190_s11 = scalar_lea.vmem [#allocation2], %s639_s9 }
 0x172   : > { %774 = vmatprep.subr.bf16.mxu1 %v741_v52  ;;  %742 = vmatprep.subr.bf16.mxu0 %v741_v52  ;;  %s576_s12 = sshll.u32 %s190_s11, 4  ;;  %s1106_s12 = int_to_ptr.vmem [resolvable:$true] %s576_s12 }
 0x173   : > { %s835_s23 = scalar_lea.vmem %s1106_s12, 64  ;;  %p842_p0 = scmp.lt.s32.totalorder %s1106_s12, %s840_s27 }
 0x174   : > { %p836_p11 = scmp.ne.s32.totalorder %s1106_s12, %s835_s23  ;;  %p843_p1 = scmp.lt.s32.totalorder %s841_s28, %s835_s23 }
 0x175   : > { %776 = vmatpush3.bf16.msra.mxu1 %v743_v55  ;;  %744 = vmatpush3.bf16.msra.mxu0 %v743_v55 }
 0x176   : > { %778 = vmatprep.subr.bf16.mxu1 %v745_v60  ;;  %746 = vmatprep.subr.bf16.mxu0 %v745_v60  ;;  %p837_p12 = pnand %p836_p11, %p970_p5  ;;  %p844_p2 = por %p843_p1, %p842_p0 }
 0x178   : > { %p838_p13 = pneg %p837_p12 }
 0x179   : > { %780 = vmatpush3.bf16.msra.mxu1 %v747_v62  ;;  %748 = vmatpush3.bf16.msra.mxu0 %v747_v62 }
 0x17a   : > { %p845_p3 = pnand %p844_p2, %p838_p13 }
 0x1dd   : > { %v357_v56 = vpop.permute.xlu1 %356 }
 0x1e1   : > { %v359_v63 = vpop.permute.xlu1 %358 }
 0x1e2   : > { %v361_v0 = vsel %vm360_vm1, %v357_v56, %v359_v63  ;;  %v365_v2 = vsel %vm360_vm1, %v359_v63, %v357_v56 }
 0x1e3   : > { %v366_v1 = vmax.f32 %v995_v11, %v361_v0  ;;  %v367_v3 = vmax.f32 %v1028_v26, %v365_v2 }
 0x1e5   : > { %370 = vrot.lane.b32.xlu1 %v366_v1, %s905_s8 }
 0x1e9   : > { %372 = vrot.lane.b32.xlu1 %v367_v3, %s905_s8 }
 0x257   : > { %v371_v4 = vpop.permute.xlu1 %370 }
 0x25b   : > { %v373_v5 = vpop.permute.xlu1 %372 }
 0x25c   : > { %v375_v6 = vsel %vm374_vm2, %v371_v4, %v373_v5  ;;  %v379_v7 = vsel %vm374_vm2, %v373_v5, %v371_v4 }
 0x25d   : > { %v380_v8 = vmax.f32 %v366_v1, %v375_v6  ;;  %v381_v9 = vmax.f32 %v367_v3, %v379_v7 }
 0x25f   : > { %v415_v10 = vpack.c.bf16 %v381_v9, %v381_v9  ;;  %v414_v12 = vpack.c.bf16 %v380_v8, %v380_v8 }
 0x261   : > { %v417_v13 = vunpack.c.l.bf16 %v415_v10  ;;  %v416_v14 = vunpack.c.l.bf16 %v414_v12 }
 0x263   : > { %554 = vmatprep.mubr.f32.mxu1 %v417_v13  ;;  %v419_v11 = vsub.f32 %v381_v9, %v417_v13  ;;  %v418_v15 = vsub.f32 %v380_v8, %v416_v14 }
 0x264   : > { %555 = vmatmul.mubr.f32.vlgmr.msra.gmra.mrb[0].mxu1 %v416_v14 }
 0x265   : > { %484 = vmatprep.mubr.f32.mxu0 %v419_v11 }
 0x266   : > { %485 = vmatmul.mubr.f32.vlgmr.msra.gmra.mrb[0].mxu0 %v418_v15 }
 0x337   : > { %v714_v16 = vpop.f32.mrb[0].mxu1 }
 0x338   : > { %v715_v17 = vpop.f32.mrb[1].mxu1 }
 0x339   : > { %v716_v18 = vadd.f32 %v715_v17, %v714_v16  ;;  %v679_v19 = vpop.f32.mrb[0].mxu0 }
 0x33a   : > { %v680_v20 = vpop.f32.mrb[1].mxu0 }
 0x33b   : > { %v681_v21 = vadd.f32 %v680_v20, %v679_v19 }
 0x33d   : > { %v557_v22 = vadd.f32 %v716_v18, %v681_v21 }
 0x33f   : > { %561 = vst.msk [vmem:[%s190_s11] sm:$0xf] %vm560_vm3, %v557_v22 }
 0x340   : > { %848 = shalt.err (!%p845_p3)
}
 0x341   : > { %s849_s29 = scalar_lea.hbm %s1104_s20, 64  ;;  %s853_s7 = scalar_lea.hbm %s1150_s4, 128 }
 0x342   : > { %p850_p4 = scmp.ne.s32.totalorder %s1104_s20, %s849_s29  ;;  %p854_p9 = scmp.lt.u32.totalorder %s1104_s20, %s1150_s4 }
 0x343   : > { %p855_p10 = scmp.lt.u32.totalorder %s853_s7, %s849_s29  ;;  %p857_p12 = scmp.lt.u32.totalorder %s849_s29, %s1104_s20 }
 0x344   : > { %p851_p7 = pnand %p850_p4, %p970_p5 }
 0x345   : > { %p856_p11 = por %p855_p10, %p854_p9 }
 0x346   : > { %p852_p8 = pneg %p851_p7 }
 0x347   : > { %p858_p13 = por %p857_p12, %p856_p11 }
 0x349   : > { %p859_p0 = pnand %p858_p13, %p852_p8 }
 0x34b   : > { %862 = shalt.err (!%p859_p0)
}
 0x34c   : > { %781 = dma.vmem_to_hbm [thread:$0]  (%p970_p5), %s1106_s12, 64, %s1104_s20, %s563_s22  }
 0x34d PF: > { %p787_p1 = scmp.ge.s32.totalorder %s897_s18, 2  ;;  %s588_s9 = sand.u32 1, %s885_s15  }
 0x34e   : > { %s589_s10 = scalar_lea.sflag [#allocation3], %s588_s9 }
 0x34f   : > { %p784_p2 = pnand %p787_p1, %p974_p6 }
 0x351   : > { %880 = dma.done.wait (!%p784_p2), %s589_s10, 64  }
 0x352   : > { %882 = vsyncadd (!%p784_p2), %s589_s10, 4294967232  ;;  %p14_p3 = scmp.ge.s32.totalorder %s957_s21, 4   ;;  %s1153_s15 = smov %s889_s16 }
 0x353   : > { %s1154_s16 = smov %s893_s17  ;;  %s1155_s17 = smov %s968_s24 }
 0x354   : > { %s1156_s18 = smov %s957_s21  ;;  %16 = sbr.rel (!%p14_p3) target bundleno = 3 (0x3), region = 71 }
 0x35b   :  { %594 = vsyncpa [#allocation3], 1 }
 0x35c   :  { %596 = vsyncpa [#allocation3 + $0x1], 1 }

</bundles_post_ra>
